<compile_context>
chip_gen: v7x
topology: tpu7x:2x2x1
jax: 0.10.0
libtpu: 0.0.40
codegen_flags: <defaults>
</compile_context>

<pallas_src>
import jax
import jax.numpy as jnp
from jax.experimental import pallas as pl
from jax.experimental.pallas import tpu as pltpu

IN_FEATURES = 1024
OUT_FEATURES = 14

_MIN_SPLIT_ROWS = 256  # only bother splitting for 2-TC sharding above this batch size


def linear_kernel(x_ref, w_ref, b_ref, o_ref):
    # x_ref: (tile_b, 1024)  w_ref: (1024, 14)  b_ref: (1, 14)  o_ref: (tile_b, 14)
    acc = jnp.dot(x_ref[...], w_ref[...], preferred_element_type=jnp.float32)
    o_ref[...] = (acc + b_ref[...]).astype(o_ref.dtype)


def pack_params(weight, bias):
    """Call ONCE at parameter-init time (not per forward).

    weight: (14, 1024) in PyTorch nn.Linear layout; bias: (14,).
    Returns (w_t, b_row) = ((1024, 14), (1, 14)) ready for the kernel.
    """
    return weight.T, bias.reshape(1, OUT_FEATURES)


def _round_up(n, m):
    return ((n + m - 1) // m) * m


def _default_tile_b():
    # Per-generation tile sizing (all under the scoped VMEM defaults, see header).
    try:
        kind = jax.devices()[0].device_kind.lower()
    except Exception:
        return 1024
    if ("v6" in kind) or ("trillium" in kind) or ("v7" in kind):
        return 2048
    return 1024  # v5e / unknown: stay under the 16 MiB scoped VMEM default


def classificator_forward(x, w_t, b_row, *, tile_b=None, use_bf16=False):
    """x: (B, 1024); w_t: (1024, 14); b_row: (1, 14) -> (B, 14) in x's dtype."""
    B, K = x.shape
    N = w_t.shape[1]
    out_dtype = x.dtype

    if use_bf16:
        # Opt-in: halve HBM traffic on the dominant x stream; MXU still accumulates f32.
        x = x.astype(jnp.bfloat16)
        w_t = w_t.astype(jnp.bfloat16)

    if tile_b is None:
        tile_b = _default_tile_b()

    # Never DMA a block (much) larger than the batch itself; keep rows 8-aligned.
    tile_b = max(8, min(tile_b, _round_up(B, 8)))
    # For large batches that would fit in one tile, split into >=2 grid steps so the
    # "parallel" axis can shard across v7x's 2 TensorCores (no-op on 1-TC chips).
    if B >= 2 * _MIN_SPLIT_ROWS and pl.cdiv(B, tile_b) < 2:
        tile_b = _round_up(pl.cdiv(B, 2), 8)

    grid = (pl.cdiv(B, tile_b),)

    cost = pl.CostEstimate(
        flops=2 * B * K * N,
        transcendentals=0,
        bytes_accessed=(
            B * K * x.dtype.itemsize
            + K * N * w_t.dtype.itemsize
            + N * b_row.dtype.itemsize
            + B * N * jnp.dtype(out_dtype).itemsize
        ),
    )

    return pl.pallas_call(
        linear_kernel,
        out_shape=jax.ShapeDtypeStruct((B, N), out_dtype),
        grid_spec=pltpu.PrefetchScalarGridSpec(
            num_scalar_prefetch=0,
            grid=grid,
            in_specs=[
                pl.BlockSpec((tile_b, K), lambda i: (i, 0)),  # x: tiled over batch
                pl.BlockSpec((K, N), lambda i: (0, 0)),       # weight: VMEM-resident
                pl.BlockSpec((1, N), lambda i: (0, 0)),       # bias: VMEM-resident
            ],
            out_specs=pl.BlockSpec((tile_b, N), lambda i: (i, 0)),
        ),
        compiler_params=pltpu.CompilerParams(
            dimension_semantics=("parallel",),  # megacore / 2-TC sharding on v7x
        ),
        cost_estimate=cost,
    )(x, w_t, b_row)


if __name__ == "__main__":
    key = jax.random.PRNGKey(0)
    k_x, k_w, k_b, k_x2 = jax.random.split(key, 4)

    # Deterministic parameter init (mimics nn.Linear's uniform(-1/sqrt(in), 1/sqrt(in)))
    bound = 1.0 / (IN_FEATURES ** 0.5)
    weight = jax.random.uniform(
        k_w, (OUT_FEATURES, IN_FEATURES), dtype=jnp.float32, minval=-bound, maxval=bound
    )
    bias = jax.random.uniform(
        k_b, (OUT_FEATURES,), dtype=jnp.float32, minval=-bound, maxval=bound
    )

    # Pack params once (outside the per-call path), then jit the forward.
    w_t, b_row = pack_params(weight, bias)
    fwd = jax.jit(classificator_forward, static_argnames=("tile_b", "use_bf16"))

    # --- Test 1: small exact batch, f32 (default path) ---------------------------
    B = 8
    x = jax.random.normal(k_x, (B, IN_FEATURES), dtype=jnp.float32)
    out = jax.block_until_ready(fwd(x, w_t, b_row))
    ref = x @ weight.T + bias
    assert out.shape == (B, OUT_FEATURES), out.shape
    assert jnp.allclose(out, ref, atol=1e-4, rtol=1e-4), "f32 mismatch vs reference"

    # --- Test 2: ragged batch + multi-step grid (no jnp.pad / slice path) --------
    B2 = 50
    x2 = jax.random.normal(k_x2, (B2, IN_FEATURES), dtype=jnp.float32)
    out2 = jax.block_until_ready(fwd(x2, w_t, b_row, tile_b=16))  # grid=4, masked last block
    ref2 = x2 @ weight.T + bias
    assert out2.shape == (B2, OUT_FEATURES), out2.shape
    assert jnp.allclose(out2, ref2, atol=1e-4, rtol=1e-4), "ragged f32 mismatch vs reference"

    # --- Test 3: opt-in bf16 input path (f32 accumulation), loose tolerance ------
    out_bf16 = jax.block_until_ready(fwd(x, w_t, b_row, use_bf16=True))
    assert out_bf16.shape == (B, OUT_FEATURES), out_bf16.shape
    assert jnp.allclose(out_bf16.astype(jnp.float32), ref, atol=5e-2, rtol=5e-2), \
        "bf16 path mismatch vs reference (beyond loose tolerance)"

    print("KERNEL_OK")
</pallas_src>

<mosaic_0001>
module attributes {stable_mosaic.version = 11 : i64} {
  func.func @linear_kernel(%arg0: i32, %arg1: memref<8x1024xf32, #tpu.memory_space<vmem>>, %arg2: memref<1024x14xf32, #tpu.memory_space<vmem>>, %arg3: memref<1x14xf32, #tpu.memory_space<vmem>>, %arg4: memref<8x14xf32, #tpu.memory_space<vmem>>) attributes {dimension_semantics = [#tpu.dimension_semantics<parallel>], iteration_bounds = array<i64: 1>, scalar_prefetch = 0 : i64, scratch_operands = 0 : i64, tpu.core_type = #tpu.core_type<tc>, window_params = [{transform_indices = @transform_0, window_bounds = array<i64: 8, 1024>}, {pipeline_mode = #tpu.pipeline_mode<synchronous>, transform_indices = @transform_1, window_bounds = array<i64: 1024, 14>}, {pipeline_mode = #tpu.pipeline_mode<synchronous>, transform_indices = @transform_2, window_bounds = array<i64: 1, 14>}, {transform_indices = @transform_3, window_bounds = array<i64: 8, 14>}]} {
    %c0 = arith.constant 0 : index
    %c0_0 = arith.constant 0 : index
    %0 = vector.load %arg1[%c0, %c0_0] : memref<8x1024xf32, #tpu.memory_space<vmem>>, vector<8x1024xf32>
    %c0_1 = arith.constant 0 : index
    %c0_2 = arith.constant 0 : index
    %1 = vector.load %arg2[%c0_1, %c0_2] : memref<1024x14xf32, #tpu.memory_space<vmem>>, vector<1024x14xf32>
    %cst = arith.constant dense<0.000000e+00> : vector<8x14xf32>
    %2 = tpu.matmul %0, %1, %cst {dimension_numbers = #tpu.dot_dimension_numbers<[1], [0], [0], [1], [0, 0, 1, 1], [], []>} : vector<8x1024xf32>, vector<1024x14xf32>, vector<8x14xf32> -> vector<8x14xf32>
    %c0_3 = arith.constant 0 : index
    %c0_4 = arith.constant 0 : index
    %3 = vector.load %arg3[%c0_3, %c0_4] : memref<1x14xf32, #tpu.memory_space<vmem>>, vector<1x14xf32>
    %4 = vector.broadcast %3 : vector<1x14xf32> to vector<8x14xf32>
    %5 = arith.addf %2, %4 : vector<8x14xf32>
    %c0_5 = arith.constant 0 : index
    %c0_6 = arith.constant 0 : index
    %6 = vector.load %arg4[%c0_5, %c0_6] : memref<8x14xf32, #tpu.memory_space<vmem>>, vector<8x14xf32>
    tpu.vector_store %arg4[%c0_5, %c0_6], %5 {strides = array<i32>} : memref<8x14xf32, #tpu.memory_space<vmem>>, vector<8x14xf32>,
    return
  }
  func.func @transform_0(%arg0: i32) -> (i32, i32) {
    %c0_i32 = arith.constant 0 : i32
    %c0_i32_0 = arith.constant 0 : i32
    return %arg0, %c0_i32 : i32, i32
  }
  func.func @transform_1(%arg0: i32) -> (i32, i32) {
    %c0_i32 = arith.constant 0 : i32
    %c0_i32_0 = arith.constant 0 : i32
    %c0_i32_1 = arith.constant 0 : i32
    return %c0_i32, %c0_i32_0 : i32, i32
  }
  func.func @transform_2(%arg0: i32) -> (i32, i32) {
    %c0_i32 = arith.constant 0 : i32
    %c0_i32_0 = arith.constant 0 : i32
    %c0_i32_1 = arith.constant 0 : i32
    return %c0_i32, %c0_i32_0 : i32, i32
  }
  func.func @transform_3(%arg0: i32) -> (i32, i32) {
    %c0_i32 = arith.constant 0 : i32
    %c0_i32_0 = arith.constant 0 : i32
    return %arg0, %c0_i32 : i32, i32
  }
}

</mosaic_0001>

<bundles_post_ra>
// kernel: classificator_forward.1
= control target key start
LH: loop header
LB: loop body
LE: loop exit
PB: predicated region body
PF: predicated region fallthrough
CT: control target
= control target key end

     0   :  { %s1192_s0 = inlined_call_operand.vmem [shape: f32[8,1024], index: 0, kind: input, shape index: {}]   ;;  %s1193_s1 = inlined_call_operand.vmem [shape: f32[1024,14], index: 1, kind: input, shape index: {}]   ;;  %s1194_s2 = inlined_call_operand.vmem [shape: f32[1,14], index: 2, kind: input, shape index: {}]   ;;  %s1195_s3 = inlined_call_operand.hbm [shape: f32[8,14], index: 3, kind: output, shape index: {}]  }
   0x1   :  { %v39_v0 = vld [vmem:[%s1193_s1 + $0x80] sm:$0xff]  ;;  %v40_v1 = vld [vmem:[%s1193_s1 + $0x88] sm:$0xff]  ;;  %v41_v11 = vld [vmem:[%s1193_s1 + $0x90] sm:$0xff] }
   0x2   :  { %v23_v2 = vld [vmem:[%s1193_s1] sm:$0xff]  ;;  %v595_v3 = vpack.c.bf16 %v40_v1, %v39_v0  ;;  %v24_v4 = vld [vmem:[%s1193_s1 + $0x8] sm:$0xff]  ;;  %v42_v13 = vld [vmem:[%s1193_s1 + $0x98] sm:$0xff] }
   0x3   :  { %v71_v5 = vld [vmem:[%s1193_s1 + $0x180] sm:$0xff]  ;;  %v72_v6 = vld [vmem:[%s1193_s1 + $0x188] sm:$0xff]  ;;  %v597_v7 = vpack.c.bf16 %v24_v4, %v23_v2  ;;  %v25_v14 = vld [vmem:[%s1193_s1 + $0x10] sm:$0xff]  ;;  %v599_v16 = vpack.c.bf16 %v42_v13, %v41_v11 }
   0x4   :  { %v627_v8 = vpack.c.bf16 %v72_v6, %v71_v5  ;;  %v55_v9 = vld [vmem:[%s1193_s1 + $0x100] sm:$0xff]  ;;  %v56_v10 = vld [vmem:[%s1193_s1 + $0x108] sm:$0xff]  ;;  %596 = vmatprep.subr.bf16.mxu0 %v595_v3  ;;  %v26_v15 = vld [vmem:[%s1193_s1 + $0x18] sm:$0xff] }
   0x5   :  { %v629_v12 = vpack.c.bf16 %v56_v10, %v55_v9  ;;  %598 = vmatpush3.bf16.msra.mxu0 %v597_v7  ;;  %v601_v17 = vpack.c.bf16 %v26_v15, %v25_v14  ;;  %v73_v18 = vld [vmem:[%s1193_s1 + $0x190] sm:$0xff]  ;;  %v74_v19 = vld [vmem:[%s1193_s1 + $0x198] sm:$0xff]  ;;  %v43_v23 = vld [vmem:[%s1193_s1 + $0xa0] sm:$0xff] }
   0x6   :  { %628 = vmatprep.subr.bf16.mxu1 %v627_v8  ;;  %v57_v20 = vld [vmem:[%s1193_s1 + $0x110] sm:$0xff]  ;;  %v631_v21 = vpack.c.bf16 %v74_v19, %v73_v18  ;;  %v58_v22 = vld [vmem:[%s1193_s1 + $0x118] sm:$0xff]  ;;  %v44_v24 = vld [vmem:[%s1193_s1 + $0xa8] sm:$0xff]  ;;  %600 = vmatprep.subr.bf16.mxu0 %v599_v16 }
   0x7   :  { %630 = vmatpush3.bf16.msra.mxu1 %v629_v12  ;;  %v633_v25 = vpack.c.bf16 %v58_v22, %v57_v20  ;;  %v603_v26 = vpack.c.bf16 %v44_v24, %v43_v23  ;;  %v27_v27 = vld [vmem:[%s1193_s1 + $0x20] sm:$0xff]  ;;  %v28_v28 = vld [vmem:[%s1193_s1 + $0x28] sm:$0xff]  ;;  %v45_v35 = vld [vmem:[%s1193_s1 + $0xb0] sm:$0xff] }
   0x8   :  { %v75_v29 = vld [vmem:[%s1193_s1 + $0x1a0] sm:$0xff]  ;;  %632 = vmatprep.subr.bf16.mxu1 %v631_v21  ;;  %v76_v30 = vld [vmem:[%s1193_s1 + $0x1a8] sm:$0xff]  ;;  %v605_v33 = vpack.c.bf16 %v28_v28, %v27_v27  ;;  %v46_v36 = vld [vmem:[%s1193_s1 + $0xb8] sm:$0xff] }
   0x9   :  { %v59_v31 = vld [vmem:[%s1193_s1 + $0x120] sm:$0xff]  ;;  %v60_v32 = vld [vmem:[%s1193_s1 + $0x128] sm:$0xff]  ;;  %602 = vmatpush3.bf16.msra.mxu0 %v601_v17  ;;  %v635_v34 = vpack.c.bf16 %v76_v30, %v75_v29  ;;  %v29_v37 = vld [vmem:[%s1193_s1 + $0x30] sm:$0xff]  ;;  %v607_v39 = vpack.c.bf16 %v46_v36, %v45_v35 }
   0xa   :  { %604 = vmatprep.subr.bf16.mxu0 %v603_v26  ;;  %v637_v38 = vpack.c.bf16 %v60_v32, %v59_v31  ;;  %v30_v40 = vld [vmem:[%s1193_s1 + $0x38] sm:$0xff]  ;;  %v77_v41 = vld [vmem:[%s1193_s1 + $0x1b0] sm:$0xff]  ;;  %v47_v46 = vld [vmem:[%s1193_s1 + $0xc0] sm:$0xff] }
   0xb   :  { %634 = vmatpush3.bf16.msra.mxu1 %v633_v25  ;;  %v78_v42 = vld [vmem:[%s1193_s1 + $0x1b8] sm:$0xff]  ;;  %v61_v44 = vld [vmem:[%s1193_s1 + $0x130] sm:$0xff]  ;;  %v48_v47 = vld [vmem:[%s1193_s1 + $0xc8] sm:$0xff]  ;;  %v609_v48 = vpack.c.bf16 %v30_v40, %v29_v37 }
   0xc   :  { %636 = vmatprep.subr.bf16.mxu1 %v635_v34  ;;  %v639_v43 = vpack.c.bf16 %v78_v42, %v77_v41  ;;  %v62_v45 = vld [vmem:[%s1193_s1 + $0x138] sm:$0xff]  ;;  %v79_v49 = vld [vmem:[%s1193_s1 + $0x1c0] sm:$0xff]  ;;  %v80_v50 = vld [vmem:[%s1193_s1 + $0x1c8] sm:$0xff]  ;;  %v611_v52 = vpack.c.bf16 %v48_v47, %v47_v46 }
   0xd   :  { %606 = vmatpush3.bf16.msra.mxu0 %v605_v33  ;;  %v641_v51 = vpack.c.bf16 %v62_v45, %v61_v44  ;;  %v31_v53 = vld [vmem:[%s1193_s1 + $0x40] sm:$0xff]  ;;  %v32_v54 = vld [vmem:[%s1193_s1 + $0x48] sm:$0xff]  ;;  %v643_v56 = vpack.c.bf16 %v80_v50, %v79_v49  ;;  %v49_v58 = vld [vmem:[%s1193_s1 + $0xd0] sm:$0xff] }
   0xe   :  { %608 = vmatprep.subr.bf16.mxu0 %v607_v39  ;;  %v63_v55 = vld [vmem:[%s1193_s1 + $0x140] sm:$0xff]  ;;  %v64_v57 = vld [vmem:[%s1193_s1 + $0x148] sm:$0xff]  ;;  %v50_v59 = vld [vmem:[%s1193_s1 + $0xd8] sm:$0xff]  ;;  %v613_v62 = vpack.c.bf16 %v32_v54, %v31_v53 }
   0xf   :  { %638 = vmatpush3.bf16.msra.mxu1 %v637_v38  ;;  %v81_v60 = vld [vmem:[%s1193_s1 + $0x1d0] sm:$0xff]  ;;  %v82_v61 = vld [vmem:[%s1193_s1 + $0x1d8] sm:$0xff]  ;;  %v645_v63 = vpack.c.bf16 %v64_v57, %v63_v55  ;;  %v615_v0 = vpack.c.bf16 %v50_v59, %v49_v58  ;;  %v51_v6 = vld [vmem:[%s1193_s1 + $0xe0] sm:$0xff] }
  0x10   :  { %640 = vmatprep.subr.bf16.mxu1 %v639_v43  ;;  %v33_v1 = vld [vmem:[%s1193_s1 + $0x50] sm:$0xff]  ;;  %v34_v2 = vld [vmem:[%s1193_s1 + $0x58] sm:$0xff]  ;;  %v647_v4 = vpack.c.bf16 %v82_v61, %v81_v60  ;;  %v52_v7 = vld [vmem:[%s1193_s1 + $0xe8] sm:$0xff] }
  0x11   :  { %610 = vmatpush3.bf16.msra.mxu0 %v609_v48  ;;  %v65_v3 = vld [vmem:[%s1193_s1 + $0x150] sm:$0xff]  ;;  %v66_v5 = vld [vmem:[%s1193_s1 + $0x158] sm:$0xff]  ;;  %v83_v8 = vld [vmem:[%s1193_s1 + $0x1e0] sm:$0xff]  ;;  %v617_v10 = vpack.c.bf16 %v34_v2, %v33_v1  ;;  %v619_v14 = vpack.c.bf16 %v52_v7, %v51_v6 }
  0x12   :  { %612 = vmatprep.subr.bf16.mxu0 %v611_v52  ;;  %v84_v9 = vld [vmem:[%s1193_s1 + $0x1e8] sm:$0xff]  ;;  %v35_v11 = vld [vmem:[%s1193_s1 + $0x60] sm:$0xff]  ;;  %v649_v13 = vpack.c.bf16 %v66_v5, %v65_v3  ;;  %v53_v19 = vld [vmem:[%s1193_s1 + $0xf0] sm:$0xff] }
  0x13   :  { %642 = vmatpush3.bf16.msra.mxu1 %v641_v51  ;;  %v36_v12 = vld [vmem:[%s1193_s1 + $0x68] sm:$0xff]  ;;  %v67_v15 = vld [vmem:[%s1193_s1 + $0x160] sm:$0xff]  ;;  %v651_v18 = vpack.c.bf16 %v84_v9, %v83_v8  ;;  %v54_v20 = vld [vmem:[%s1193_s1 + $0xf8] sm:$0xff] }
  0x14   :  { %644 = vmatprep.subr.bf16.mxu1 %v643_v56  ;;  %v68_v16 = vld [vmem:[%s1193_s1 + $0x168] sm:$0xff]  ;;  %v18_v21 = vld [vmem:[%s1192_s0 + $0x18] sm:$0xff]  ;;  %v85_v22 = vld [vmem:[%s1193_s1 + $0x1f0] sm:$0xff]  ;;  %v621_v24 = vpack.c.bf16 %v36_v12, %v35_v11  ;;  %v623_v26 = vpack.c.bf16 %v54_v20, %v53_v19 }
  0x15   :  { %614 = vmatpush3.bf16.msra.mxu0 %v613_v62  ;;  %v16_v17 = vld [vmem:[%s1192_s0 + $0x8] sm:$0xff]  ;;  %v86_v23 = vld [vmem:[%s1193_s1 + $0x1f8] sm:$0xff]  ;;  %292 = vmatprep.mubr.f32.mxu1 %v18_v21  ;;  %v653_v25 = vpack.c.bf16 %v68_v16, %v67_v15  ;;  %v37_v27 = vld [vmem:[%s1193_s1 + $0x70] sm:$0xff] }
  0x16   :  { %616 = vmatprep.subr.bf16.mxu0 %v615_v0  ;;  %222 = vmatprep.mubr.f32.mxu0 %v16_v17  ;;  %v38_v28 = vld [vmem:[%s1193_s1 + $0x78] sm:$0xff]  ;;  %v69_v29 = vld [vmem:[%s1193_s1 + $0x170] sm:$0xff]  ;;  %v655_v30 = vpack.c.bf16 %v86_v23, %v85_v22  ;;  %v103_v32 = vld [vmem:[%s1193_s1 + $0x280] sm:$0xff] }
  0x17   :  { %646 = vmatpush3.bf16.msra.mxu1 %v645_v63  ;;  %v70_v31 = vld [vmem:[%s1193_s1 + $0x178] sm:$0xff]  ;;  %v104_v33 = vld [vmem:[%s1193_s1 + $0x288] sm:$0xff]  ;;  %v135_v34 = vld [vmem:[%s1193_s1 + $0x380] sm:$0xff]  ;;  %v625_v36 = vpack.c.bf16 %v38_v28, %v37_v27 }
  0x18   :  { %648 = vmatprep.subr.bf16.mxu1 %v647_v4  ;;  %v136_v35 = vld [vmem:[%s1193_s1 + $0x388] sm:$0xff]  ;;  %v657_v37 = vpack.c.bf16 %v70_v31, %v69_v29  ;;  %v659_v38 = vpack.c.bf16 %v104_v33, %v103_v32  ;;  %v87_v39 = vld [vmem:[%s1193_s1 + $0x200] sm:$0xff]  ;;  %v105_v44 = vld [vmem:[%s1193_s1 + $0x290] sm:$0xff] }
  0x19   :  { %618 = vmatpush3.bf16.msra.mxu0 %v617_v10  ;;  %v88_v40 = vld [vmem:[%s1193_s1 + $0x208] sm:$0xff]  ;;  %v119_v41 = vld [vmem:[%s1193_s1 + $0x300] sm:$0xff]  ;;  %v691_v42 = vpack.c.bf16 %v136_v35, %v135_v34  ;;  %v106_v45 = vld [vmem:[%s1193_s1 + $0x298] sm:$0xff] }
  0x1a   :  { %620 = vmatprep.subr.bf16.mxu0 %v619_v14  ;;  %v120_v43 = vld [vmem:[%s1193_s1 + $0x308] sm:$0xff]  ;;  %v137_v46 = vld [vmem:[%s1193_s1 + $0x390] sm:$0xff]  ;;  %v138_v47 = vld [vmem:[%s1193_s1 + $0x398] sm:$0xff]  ;;  %v661_v49 = vpack.c.bf16 %v88_v40, %v87_v39  ;;  %v663_v52 = vpack.c.bf16 %v106_v45, %v105_v44 }
  0x1b   :  { %650 = vmatpush3.bf16.msra.mxu1 %v649_v13  ;;  %v15_v48 = vld [vmem:[%s1192_s0] sm:$0xff]  ;;  %v17_v50 = vld [vmem:[%s1192_s0 + $0x10] sm:$0xff]  ;;  %v693_v51 = vpack.c.bf16 %v120_v43, %v119_v41  ;;  %v90_v54 = vld [vmem:[%s1193_s1 + $0x218] sm:$0xff]  ;;  %v695_v56 = vpack.c.bf16 %v138_v47, %v137_v46 }
  0x1c   :  { %652 = vmatprep.subr.bf16.mxu1 %v651_v18  ;;  %v89_v53 = vld [vmem:[%s1193_s1 + $0x210] sm:$0xff]  ;;  %v122_v57 = vld [vmem:[%s1193_s1 + $0x318] sm:$0xff]  ;;  %v107_v58 = vld [vmem:[%s1193_s1 + $0x2a0] sm:$0xff] }
  0x1d   :  { %622 = vmatpush3.bf16.msra.mxu0 %v621_v24  ;;  %v121_v55 = vld [vmem:[%s1193_s1 + $0x310] sm:$0xff]  ;;  %v108_v59 = vld [vmem:[%s1193_s1 + $0x2a8] sm:$0xff]  ;;  %v139_v60 = vld [vmem:[%s1193_s1 + $0x3a0] sm:$0xff]  ;;  %v665_v62 = vpack.c.bf16 %v90_v54, %v89_v53 }
  0x1e   :  { %624 = vmatprep.subr.bf16.mxu0 %v623_v26  ;;  %v140_v61 = vld [vmem:[%s1193_s1 + $0x3a8] sm:$0xff]  ;;  %v697_v63 = vpack.c.bf16 %v122_v57, %v121_v55  ;;  %v667_v0 = vpack.c.bf16 %v108_v59, %v107_v58  ;;  %v91_v1 = vld [vmem:[%s1193_s1 + $0x220] sm:$0xff]  ;;  %v109_v6 = vld [vmem:[%s1193_s1 + $0x2b0] sm:$0xff] }
  0x1f   :  { %654 = vmatpush3.bf16.msra.mxu1 %v653_v25  ;;  %v92_v2 = vld [vmem:[%s1193_s1 + $0x228] sm:$0xff]  ;;  %v123_v3 = vld [vmem:[%s1193_s1 + $0x320] sm:$0xff]  ;;  %v699_v4 = vpack.c.bf16 %v140_v61, %v139_v60  ;;  %v110_v7 = vld [vmem:[%s1193_s1 + $0x2b8] sm:$0xff] }
  0x20   :  { %656 = vmatprep.subr.bf16.mxu1 %v655_v30  ;;  %v124_v5 = vld [vmem:[%s1193_s1 + $0x328] sm:$0xff]  ;;  %v141_v8 = vld [vmem:[%s1193_s1 + $0x3b0] sm:$0xff]  ;;  %v142_v9 = vld [vmem:[%s1193_s1 + $0x3b8] sm:$0xff]  ;;  %v669_v10 = vpack.c.bf16 %v92_v2, %v91_v1  ;;  %v671_v12 = vpack.c.bf16 %v110_v7, %v109_v6 }
  0x21   :  { %626 = vmatpush3.bf16.msra.mxu0 %v625_v36  ;;  %v701_v11 = vpack.c.bf16 %v124_v5, %v123_v3  ;;  %v93_v13 = vld [vmem:[%s1193_s1 + $0x230] sm:$0xff]  ;;  %v94_v14 = vld [vmem:[%s1193_s1 + $0x238] sm:$0xff]  ;;  %v703_v16 = vpack.c.bf16 %v142_v9, %v141_v8  ;;  %v111_v18 = vld [vmem:[%s1193_s1 + $0x2c0] sm:$0xff] }
  0x22   :  { %660 = vmatprep.subr.bf16.mxu0 %v659_v38  ;;  %v125_v15 = vld [vmem:[%s1193_s1 + $0x330] sm:$0xff]  ;;  %v126_v17 = vld [vmem:[%s1193_s1 + $0x338] sm:$0xff]  ;;  %v112_v19 = vld [vmem:[%s1193_s1 + $0x2c8] sm:$0xff]  ;;  %v673_v22 = vpack.c.bf16 %v94_v14, %v93_v13 }
  0x23   :  { %658 = vmatpush3.bf16.msra.mxu1 %v657_v37  ;;  %v143_v20 = vld [vmem:[%s1193_s1 + $0x3c0] sm:$0xff]  ;;  %v144_v21 = vld [vmem:[%s1193_s1 + $0x3c8] sm:$0xff]  ;;  %v22_v25 = vld [vmem:[%s1192_s0 + $0x38] sm:$0xff]  ;;  %v705_v26 = vpack.c.bf16 %v126_v17, %v125_v15  ;;  %v675_v27 = vpack.c.bf16 %v112_v19, %v111_v18 }
  0x24   :  { %692 = vmatprep.subr.bf16.mxu1 %v691_v42  ;;  %223 = vmatmul.mubr.f32.vlgmr.msra.gmra.mrb[0].mxu0 %v15_v48  ;;  %v95_v23 = vld [vmem:[%s1193_s1 + $0x240] sm:$0xff]  ;;  %v20_v24 = vld [vmem:[%s1192_s0 + $0x28] sm:$0xff] }
  0x25   :  { %662 = vmatpush3.bf16.msra.mxu0 %v661_v49  ;;  %v96_v28 = vld [vmem:[%s1193_s1 + $0x248] sm:$0xff]  ;;  %v127_v29 = vld [vmem:[%s1193_s1 + $0x340] sm:$0xff] }
  0x26   :  { %293 = vmatmul.mubr.f32.vlgmr.msra.gmra.mrb[0].mxu1 %v17_v50  ;;  %664 = vmatprep.subr.bf16.mxu0 %v663_v52 }
  0x27   :  { %694 = vmatpush3.bf16.msra.mxu1 %v693_v51 }
  0x28   :  { %696 = vmatprep.subr.bf16.mxu1 %v695_v56 }
  0x29   :  { %666 = vmatpush3.bf16.msra.mxu0 %v665_v62 }
  0x2a   :  { %668 = vmatprep.subr.bf16.mxu0 %v667_v0 }
  0x2b   :  { %698 = vmatpush3.bf16.msra.mxu1 %v697_v63 }
  0x2c   :  { %700 = vmatprep.subr.bf16.mxu1 %v699_v4 }
  0x2d   :  { %670 = vmatpush3.bf16.msra.mxu0 %v669_v10 }
  0x2e   :  { %672 = vmatprep.subr.bf16.mxu0 %v671_v12 }
  0x2f   :  { %702 = vmatpush3.bf16.msra.mxu1 %v701_v11 }
  0x30   :  { %8 = vsyncpa [#allocation3], 0  ;;  %704 = vmatprep.subr.bf16.mxu1 %v703_v16  ;;  %v707_v30 = vpack.c.bf16 %v144_v21, %v143_v20  ;;  %v128_v31 = vld [vmem:[%s1193_s1 + $0x348] sm:$0xff]  ;;  %v113_v32 = vld [vmem:[%s1193_s1 + $0x2d0] sm:$0xff]  ;;  %362 = vmatprep.mubr.f32.mxu0 %v20_v24  ;;  %v677_v36 = vpack.c.bf16 %v96_v28, %v95_v23  ;;  %vm438_vm0 = vcmask 113664  }
  0x31   :  { %v114_v33 = vld [vmem:[%s1193_s1 + $0x2d8] sm:$0xff]  ;;  %v145_v34 = vld [vmem:[%s1193_s1 + $0x3d0] sm:$0xff]  ;;  %432 = vmatprep.mubr.f32.mxu1 %v22_v25  ;;  %674 = vmatpush3.bf16.msra.mxu0 %v673_v22  ;;  %v709_v37 = vpack.c.bf16 %v128_v31, %v127_v29  ;;  %v115_v44 = vld [vmem:[%s1193_s1 + $0x2e0] sm:$0xff] }
  0x32   :  { %v146_v35 = vld [vmem:[%s1193_s1 + $0x3d8] sm:$0xff]  ;;  %676 = vmatprep.subr.bf16.mxu0 %v675_v27  ;;  %v679_v38 = vpack.c.bf16 %v114_v33, %v113_v32  ;;  %v97_v39 = vld [vmem:[%s1193_s1 + $0x250] sm:$0xff]  ;;  %v116_v45 = vld [vmem:[%s1193_s1 + $0x2e8] sm:$0xff] }
  0x33   :  { %706 = vmatpush3.bf16.msra.mxu1 %v705_v26  ;;  %v98_v40 = vld [vmem:[%s1193_s1 + $0x258] sm:$0xff]  ;;  %v129_v41 = vld [vmem:[%s1193_s1 + $0x350] sm:$0xff]  ;;  %v711_v42 = vpack.c.bf16 %v146_v35, %v145_v34  ;;  %v147_v46 = vld [vmem:[%s1193_s1 + $0x3e0] sm:$0xff]  ;;  %v683_v50 = vpack.c.bf16 %v116_v45, %v115_v44 }
  0x34   :  { %708 = vmatprep.subr.bf16.mxu1 %v707_v30  ;;  %v130_v43 = vld [vmem:[%s1193_s1 + $0x358] sm:$0xff]  ;;  %v148_v47 = vld [vmem:[%s1193_s1 + $0x3e8] sm:$0xff]  ;;  %v681_v48 = vpack.c.bf16 %v98_v40, %v97_v39  ;;  %v99_v51 = vld [vmem:[%s1193_s1 + $0x260] sm:$0xff] }
  0x35   :  { %678 = vmatpush3.bf16.msra.mxu0 %v677_v36  ;;  %v713_v49 = vpack.c.bf16 %v130_v43, %v129_v41  ;;  %v100_v52 = vld [vmem:[%s1193_s1 + $0x268] sm:$0xff]  ;;  %v131_v53 = vld [vmem:[%s1193_s1 + $0x360] sm:$0xff]  ;;  %v715_v54 = vpack.c.bf16 %v148_v47, %v147_v46  ;;  %v117_v56 = vld [vmem:[%s1193_s1 + $0x2f0] sm:$0xff] }
  0x36   :  { %680 = vmatprep.subr.bf16.mxu0 %v679_v38  ;;  %v132_v55 = vld [vmem:[%s1193_s1 + $0x368] sm:$0xff]  ;;  %v118_v57 = vld [vmem:[%s1193_s1 + $0x2f8] sm:$0xff]  ;;  %v149_v58 = vld [vmem:[%s1193_s1 + $0x3f0] sm:$0xff]  ;;  %v685_v60 = vpack.c.bf16 %v100_v52, %v99_v51 }
  0x37   :  { %710 = vmatpush3.bf16.msra.mxu1 %v709_v37  ;;  %v150_v59 = vld [vmem:[%s1193_s1 + $0x3f8] sm:$0xff]  ;;  %v717_v61 = vpack.c.bf16 %v132_v55, %v131_v53  ;;  %v687_v62 = vpack.c.bf16 %v118_v57, %v117_v56  ;;  %v101_v63 = vld [vmem:[%s1193_s1 + $0x270] sm:$0xff]  ;;  %v19_v6 = vld [vmem:[%s1192_s0 + $0x20] sm:$0xff] }
  0x38   :  { %712 = vmatprep.subr.bf16.mxu1 %v711_v42  ;;  %v102_v0 = vld [vmem:[%s1193_s1 + $0x278] sm:$0xff]  ;;  %v719_v1 = vpack.c.bf16 %v150_v59, %v149_v58  ;;  %v133_v2 = vld [vmem:[%s1193_s1 + $0x370] sm:$0xff]  ;;  %v454_v9 = vld [vmem:[%s1194_s2] ss:$0 sm:$0xff] }
  0x39   :  { %682 = vmatpush3.bf16.msra.mxu0 %v681_v48  ;;  %v134_v3 = vld [vmem:[%s1193_s1 + $0x378] sm:$0xff]  ;;  %v689_v4 = vpack.c.bf16 %v102_v0, %v101_v63  ;;  %v21_v7 = vld [vmem:[%s1192_s0 + $0x30] sm:$0xff]  ;;  %s748_s0 = smov [#allocation2]  }
  0x3a   :  { %684 = vmatprep.subr.bf16.mxu0 %v683_v50  ;;  %v721_v5 = vpack.c.bf16 %v134_v3, %v133_v2  ;;  %s446_s15 = sshll.u32 %s748_s0, 4  ;;  %s447_s15 = int_to_ptr.vmem [resolvable:$true] %s446_s15 }
  0x3b   :  { %714 = vmatpush3.bf16.msra.mxu1 %v713_v49  ;;  %s724_s2 = scalar_lea.vmem %s447_s15, 128  ;;  %p729_p1 = scmp.lt.s32.totalorder %s447_s15, %s447_s15 }
  0x3c   :  { %716 = vmatprep.subr.bf16.mxu1 %v715_v54  ;;  %p725_p0 = scmp.ne.s32.totalorder %s447_s15, %s724_s2  ;;  %p730_p2 = scmp.lt.s32.totalorder %s724_s2, %s724_s2 }
  0x3d   :  { %686 = vmatpush3.bf16.msra.mxu0 %v685_v60 }
  0x3e   :  { %688 = vmatprep.subr.bf16.mxu0 %v687_v62  ;;  %p731_p3 = por %p730_p2, %p729_p1 }
  0x3f   :  { %718 = vmatpush3.bf16.msra.mxu1 %v717_v61 }
  0x40   :  { %720 = vmatprep.subr.bf16.mxu1 %v719_v1  ;;  %p732_p4 = pnand %p731_p3, %p725_p0 }
  0x41   :  { %690 = vmatpush3.bf16.msra.mxu0 %v689_v4 }
  0x43   :  { %722 = vmatpush3.bf16.msra.mxu1 %v721_v5 }
  0x44   :  { %363 = vmatmul.mubr.f32.vlgmr.msra.gmra.mrb[2].mxu0 %v19_v6 }
  0x46   :  { %433 = vmatmul.mubr.f32.vlgmr.msra.gmra.mrb[2].mxu1 %v21_v7 }
  0xf7   :  { %v487_v8 = vpop.f32.mrb[0].mxu0 }
  0xf8   :  { %v488_v10 = vpop.f32.mrb[1].mxu0 }
  0xf9   :  { %v522_v11 = vpop.f32.mrb[0].mxu1  ;;  %v489_v12 = vadd.f32 %v488_v10, %v487_v8 }
  0xfa   :  { %v523_v13 = vpop.f32.mrb[1].mxu1 }
  0xfb   :  { %v524_v14 = vadd.f32 %v523_v13, %v522_v11  ;;  %v225_v15 = vadd.f32 %v489_v12, %v454_v9 }
  0xfd   :  { %v295_v16 = vadd.f32 %v524_v14, %v225_v15 }
 0x117   :  { %v557_v17 = vpop.f32.mrb[2].mxu0 }
 0x118   :  { %v558_v18 = vpop.f32.mrb[3].mxu0 }
 0x119   :  { %v592_v19 = vpop.f32.mrb[2].mxu1  ;;  %v559_v20 = vadd.f32 %v558_v18, %v557_v17 }
 0x11a   :  { %v593_v21 = vpop.f32.mrb[3].mxu1 }
 0x11b   :  { %v594_v22 = vadd.f32 %v593_v21, %v592_v19  ;;  %v365_v23 = vadd.f32 %v559_v20, %v295_v16 }
 0x11d   :  { %v435_v24 = vadd.f32 %v594_v22, %v365_v23 }
 0x11f   :  { %439 = vst.msk [vmem:[#allocation2] sm:$0xff] %vm438_vm0, %v435_v24 }
 0x120   :  { %735 = shalt.err (!%p732_p4)
}
 0x121   :  { %s736_s18 = scalar_lea.hbm %s1195_s3, 128 }
 0x122   :  { %p737_p5 = scmp.ne.s32.totalorder %s1195_s3, %s736_s18  ;;  %p740_p6 = scmp.lt.u32.totalorder %s736_s18, %s1195_s3 }
 0x124   :  { %p742_p7 = pnand %p740_p6, %p737_p5 }
 0x126   :  { %745 = shalt.err (!%p742_p7)
}
 0x127   :  { %449 = dma.vmem_to_hbm [thread:$0]  %s447_s15, 128, %s1195_s3, [#allocation3]  }
 0x128   :  { %746 = dma.done.wait [#allocation3], 128  }
 0x129   :  { %747 = vsyncadd [#allocation3], 4294967168 }
 0x12a   :  { %453 = vsyncpa [#allocation3], 1 }

</bundles_post_ra>
